<compile_context>
chip_gen: v5e
topology: v5e:2x2
jax: 0.10.0
libtpu: 0.0.40
codegen_flags: <defaults>
</compile_context>

<pallas_src>
import jax
import jax.numpy as jnp
from jax.experimental import pallas as pl
from jax.experimental.pallas import tpu as pltpu

_LANES = 128                      # TPU lane width (last-dim vreg axis)
_MAX_LANE_WIDTH = 2048            # lanes per block row (16 f32 vregs wide)
_TILE_BYTES = 4 * 1024 * 1024     # ~4 MiB per tile; 2x(in)+2x(out) ~= 16 MiB VMEM
_VMEM_LIMIT = 32 * 1024 * 1024    # safe scoped-VMEM cap on v5e/v6e/v7x


def _identity_kernel(x_ref, o_ref):
    # Pure copy of the current VMEM tile.
    o_ref[...] = x_ref[...]


def _sublane_multiple(dtype) -> int:
    """Row-tile multiple: 8 for 4-byte dtypes, 16 for bf16/f16, 32 for int8/fp8."""
    itemsize = jnp.dtype(dtype).itemsize
    return max(8, 32 // max(itemsize, 1))


def _lane_dense_cols(total: int) -> int:
    """Largest multiple of 128 (capped) that divides `total`; 0 if none exists."""
    c = min(_MAX_LANE_WIDTH, (total // _LANES) * _LANES)
    while c > 0:
        if total % c == 0:
            return c
        c -= _LANES
    return 0


def identity_pallas(x: jax.Array) -> jax.Array:
    """Pallas identity: returns an array equal to x (same shape, same dtype).

    For true zero-copy behavior, call under jax.jit with donate_argnums=0 so
    the aliased output can reuse the input's HBM buffer.
    """
    orig_shape = x.shape
    total = x.size
    if total == 0:
        return x  # nothing to copy

    itemsize = jnp.dtype(x.dtype).itemsize
    sub = _sublane_multiple(x.dtype)

    # ---- lane-dense 2D view -------------------------------------------------
    x_flat = x.reshape(total)
    cols = _lane_dense_cols(total)
    pad = 0
    if cols == 0:
        # No multiple of 128 divides `total` (tiny or awkward size): pad the
        # flattened view to a lane-dense width.  Keeps the kernel full-vreg and
        # VMEM-bounded instead of emitting one oversized / masked block.
        cols = 1024
        padded = pl.cdiv(total, cols) * cols
        pad = padded - total
        x_flat = jnp.pad(x_flat, (0, pad))
    rows = x_flat.size // cols
    x2 = x_flat.reshape(rows, cols)

    # ---- VMEM-budgeted row tile --------------------------------------------
    rows_budget = max(sub, (_TILE_BYTES // (cols * itemsize)) // sub * sub)
    if rows <= rows_budget:
        tr = rows          # full extent on the row axis: always a legal block
    else:
        tr = rows_budget   # multiple of the sublane packing; remainder masked

    grid_rows = pl.cdiv(rows, tr)

    out2 = pl.pallas_call(
        _identity_kernel,
        out_shape=jax.ShapeDtypeStruct((rows, cols), x.dtype),
        grid=(grid_rows,),
        in_specs=[pl.BlockSpec((tr, cols), lambda i: (i, 0))],
        out_specs=pl.BlockSpec((tr, cols), lambda i: (i, 0)),
        # Output aliases the input buffer: with caller-side donation the
        # identity becomes (nearly) free; otherwise XLA inserts at most one
        # defensive copy, which is the minimum an identity materialization needs.
        input_output_aliases={0: 0},
        compiler_params=pltpu.CompilerParams(
            dimension_semantics=("parallel",),
            vmem_limit_bytes=_VMEM_LIMIT,
        ),
    )(x2)

    out_flat = out2.reshape(rows * cols)
    if pad:
        out_flat = out_flat[:total]
    return out_flat.reshape(orig_shape)


if __name__ == "__main__":
    key = jax.random.PRNGKey(0)
    # NCHW input consistent with a Pix2Pix-style module: batch=2, C=4, H=W=16.
    x = jax.random.normal(key, (2, 4, 16, 16), dtype=jnp.float32)

    identity = jax.jit(identity_pallas)  # add donate_argnums=0 for zero-copy
    y = identity(x)
    jax.block_until_ready(y)

    assert y.shape == x.shape and y.dtype == x.dtype
    assert bool(jnp.array_equal(y, x))
    print("KERNEL_OK")
</pallas_src>

<mosaic_0001>
module attributes {stable_mosaic.version = 11 : i64} {
  func.func @_identity_kernel(%arg0: i32, %arg1: memref<1x2048xf32, #tpu.memory_space<vmem>>, %arg2: memref<1x2048xf32, #tpu.memory_space<vmem>>) attributes {dimension_semantics = [#tpu.dimension_semantics<parallel>], iteration_bounds = array<i64: 1>, scalar_prefetch = 0 : i64, scratch_operands = 0 : i64, tpu.core_type = #tpu.core_type<tc>, window_params = [{transform_indices = @transform_0, window_bounds = array<i64: 1, 2048>}, {transform_indices = @transform_1, window_bounds = array<i64: 1, 2048>}]} {
    %c0 = arith.constant 0 : index
    %c0_0 = arith.constant 0 : index
    %0 = vector.load %arg1[%c0, %c0_0] : memref<1x2048xf32, #tpu.memory_space<vmem>>, vector<1x2048xf32>
    %c0_1 = arith.constant 0 : index
    %c0_2 = arith.constant 0 : index
    %1 = vector.load %arg2[%c0_1, %c0_2] : memref<1x2048xf32, #tpu.memory_space<vmem>>, vector<1x2048xf32>
    tpu.vector_store %arg2[%c0_1, %c0_2], %0 {strides = array<i32>} : memref<1x2048xf32, #tpu.memory_space<vmem>>, vector<1x2048xf32>,
    return
  }
  func.func @transform_0(%arg0: i32) -> (i32, i32) {
    %c0_i32 = arith.constant 0 : i32
    %c0_i32_0 = arith.constant 0 : i32
    return %arg0, %c0_i32 : i32, i32
  }
  func.func @transform_1(%arg0: i32) -> (i32, i32) {
    %c0_i32 = arith.constant 0 : i32
    %c0_i32_0 = arith.constant 0 : i32
    return %arg0, %c0_i32 : i32, i32
  }
}

</mosaic_0001>

<bundles_post_ra>
// kernel: identity_pallas.1
= control target key start
LH: loop header
LB: loop body
LE: loop exit
PB: predicated region body
PF: predicated region fallthrough
CT: control target
= control target key end

     0   :  { %s38_s0 = inlined_call_operand.vmem [shape: f32[1,2048], index: 0, kind: input, shape index: {}, may-alias: {0,1}]   ;;  %s39_s1 = inlined_call_operand.vmem [shape: f32[1,2048], index: 1, kind: output, shape index: {}, may-alias: {0,1}]  }
   0x1   :  { %v8_v0 = vld [vmem:[%s38_s0] sm:$0xff]  ;;  %v9_v1 = vld [vmem:[%s38_s0 + $0x8] sm:$0xff] }
   0x2   :  { %10 = vst [vmem:[%s39_s1] sm:$0xff] %v8_v0 }
   0x3   :  { %11 = vst [vmem:[%s39_s1 + $0x8] sm:$0xff] %v9_v1 }

</bundles_post_ra>
